<compile_context>
chip_gen: v7x
topology: tpu7x:2x2x1
jax: 0.10.0
libtpu: 0.0.40
codegen_flags: <defaults>
</compile_context>

<pallas_src>
import functools

import jax
import jax.numpy as jnp
from jax.experimental import pallas as pl
from jax.experimental.pallas import tpu as pltpu


# Per-input, per-block byte budget (pipeline double-buffers this).
_BYTE_CAP_PER_INPUT = 6 * 1024 * 1024
# Cap on one f32 temporary inside the kernel (per chunk, per array).
_CHUNK_F32_CAP = 1 * 1024 * 1024


def _round_up(x: int, m: int) -> int:
    return -(-x // m) * m


def _round_down(x: int, m: int) -> int:
    return (x // m) * m


def _mse_partial_kernel(pred_ref, true_ref, out_ref, *,
                        chunk_rows, num_chunks, tile_rows, out_d,
                        mask_bound, needs_row_mask):
    """One grid step: partial sum of (pred - true)^2 over a (tile_rows, tile_d) block.

    The block is folded in row chunks of `chunk_rows` (static offsets, so each
    chunk is a free ref-view) into an (8, out_d) float32 accumulator:
      * sublane-group fold (rows -> 8) and lane-group fold (tile_d -> out_d)
        are pure VPU adds, no cross-lane XLU reduction, no serial grid
        dependency -> the grid stays fully "parallel".
      * f32 temporaries are bounded by the chunk size regardless of tile size.
    The tiny cross-lane scalar reduction over all partial slabs happens once,
    in the wrapper (XLA).
    """
    td = pred_ref.shape[1]

    acc = jnp.zeros((8, out_d), jnp.float32)
    for c in range(num_chunks):                      # static, fully unrolled
        start = c * chunk_rows
        p = pred_ref[pl.ds(start, chunk_rows), :].astype(jnp.float32)
        t = true_ref[pl.ds(start, chunk_rows), :].astype(jnp.float32)
        sq = p - t
        sq = sq * sq
        if needs_row_mask:
            # Tail block overhangs the batch: zero out the garbage rows.
            # Sublane-only iota; the select broadcasts it across lanes.
            row = (jax.lax.broadcasted_iota(jnp.int32, (chunk_rows, 1), 0)
                   + pl.program_id(0) * tile_rows + start)
            sq = jnp.where(row < mask_bound, sq, 0.0)
        # Sublane-group fold: (chunk_rows, td) -> (8, td)  (VPU adds only).
        folded = jnp.sum(sq.reshape(chunk_rows // 8, 8, td), axis=0)
        # Lane-group fold: (8, td) -> (8, out_d) via static 128-lane slices.
        if out_d != td:
            lane = folded[:, :out_d]
            for g in range(1, td // out_d):
                lane = lane + folded[:, g * out_d:(g + 1) * out_d]
            folded = lane
        acc = acc + folded

    out_ref[...] = acc[None, None, :, :]


def mse_loss_pallas(pred: jax.Array, true: jax.Array) -> jax.Array:
    """MSE with mean reduction, computed in a Pallas TPU kernel."""
    assert pred.shape == true.shape, "MSE requires identical shapes"
    B = pred.shape[0]
    n_elem = int(pred.size)                     # true element count (pre-padding)
    pred2 = pred.reshape(B, -1)
    true2 = true.reshape(B, -1)
    D = pred2.shape[1]
    itemsize = jnp.dtype(pred2.dtype).itemsize
    # Sublane packing: f32 -> 8 rows/vreg, bf16 -> 16, int8/fp8 -> 32.
    row_mult = max(8, 32 // itemsize)

    # ---------------- lane (feature) tiling --------------------------------
    # Widest block that fits both the input byte budget and the in-kernel f32
    # chunk budget at the minimum row count.
    max_tile_d = max(128, _round_down(
        min(_BYTE_CAP_PER_INPUT // (row_mult * itemsize),
            _CHUNK_F32_CAP // (row_mult * 4)), 128))
    D_work = D
    if D <= max_tile_d:
        tile_d = D                               # full width, any alignment
    else:
        # D-tiling: every block's lane dim must be a multiple of 128.
        D_work = _round_up(D, 128)
        if D_work != D:
            pred2 = jnp.pad(pred2, ((0, 0), (0, D_work - D)))
            true2 = jnp.pad(true2, ((0, 0), (0, D_work - D)))
        tile_d = max_tile_d
        while D_work % tile_d != 0:              # largest 128-multiple divisor
            tile_d -= 128
    num_d_tiles = D_work // tile_d
    out_d = 128 if tile_d % 128 == 0 else tile_d  # lane-folded partial width

    # ---------------- row (batch) tiling ------------------------------------
    Bp = B
    if Bp < row_mult:
        # Tiny batch: zero-pad one sublane group (zeros contribute 0).
        pad = row_mult - Bp
        pred2 = jnp.pad(pred2, ((0, pad), (0, 0)))
        true2 = jnp.pad(true2, ((0, pad), (0, 0)))
        Bp = row_mult

    max_rows = max(row_mult,
                   _round_down(_BYTE_CAP_PER_INPUT // (tile_d * itemsize), row_mult))
    chunk_rows = max(row_mult,
                     _round_down(_CHUNK_F32_CAP // (tile_d * 4), row_mult))
    chunk_rows = max(row_mult,
                     min(chunk_rows, max_rows, _round_up(Bp, row_mult)))

    tile_rows = max(chunk_rows, _round_down(max_rows, chunk_rows))
    tile_rows = min(tile_rows, _round_up(Bp, chunk_rows))   # don't exceed need
    if Bp > chunk_rows:
        # v7x megacore: make sure the parallel row axis has >= 2 steps.
        half = _round_up(_round_up(Bp, 2) // 2, chunk_rows)
        tile_rows = min(tile_rows, max(chunk_rows, half))

    num_row_tiles = -(-Bp // tile_rows)          # ceil-div, no divisibility assert
    num_chunks = tile_rows // chunk_rows
    needs_row_mask = (num_row_tiles * tile_rows) > Bp

    kernel = functools.partial(
        _mse_partial_kernel,
        chunk_rows=chunk_rows,
        num_chunks=num_chunks,
        tile_rows=tile_rows,
        out_d=out_d,
        mask_bound=Bp,
        needs_row_mask=needs_row_mask,
    )

    # VMEM budget: 2 inputs x 2 pipeline buffers x tile, plus in-kernel f32
    # chunk temporaries, plus (tiny) outputs; clamp under v7x's 64 MiB.
    tile_in_bytes = tile_rows * tile_d * itemsize
    chunk_f32_bytes = chunk_rows * tile_d * 4
    vmem_need = 4 * tile_in_bytes + 6 * chunk_f32_bytes + 4 * (8 * out_d * 4)
    vmem_limit_bytes = int(min(max(vmem_need + (4 << 20), 32 << 20), 48 << 20))

    cost = pl.CostEstimate(
        flops=3 * Bp * D_work,                   # sub + mul + add per element
        transcendentals=0,
        bytes_accessed=(2 * Bp * D_work * itemsize
                        + num_row_tiles * num_d_tiles * 8 * out_d * 4),
    )

    partials = pl.pallas_call(
        kernel,
        out_shape=jax.ShapeDtypeStruct(
            (num_row_tiles, num_d_tiles, 8, out_d), jnp.float32),
        grid_spec=pltpu.PrefetchScalarGridSpec(
            num_scalar_prefetch=0,
            grid=(num_row_tiles, num_d_tiles),
            in_specs=[
                pl.BlockSpec((tile_rows, tile_d), lambda i, j: (i, j)),
                pl.BlockSpec((tile_rows, tile_d), lambda i, j: (i, j)),
            ],
            out_specs=pl.BlockSpec((1, 1, 8, out_d), lambda i, j: (i, j, 0, 0)),
        ),
        compiler_params=pltpu.CompilerParams(
            dimension_semantics=("parallel", "parallel"),  # independent partials
            vmem_limit_bytes=vmem_limit_bytes,
        ),
        cost_estimate=cost,
    )(pred2, true2)

    # Tiny final reduction over the partial slabs, done by XLA.
    return (jnp.sum(partials) / jnp.float32(n_elem)).astype(jnp.float32)


def loss_wrapper_forward(pred: jax.Array, true: jax.Array) -> jax.Array:
    """JAX/Pallas equivalent of LossWrapper.forward with loss = nn.MSELoss()."""
    assert pred.shape[0] == true.shape[0]
    if pred.shape[0] == 0:
        return jnp.float32(0.0)                  # torch.tensor(0).float()
    return mse_loss_pallas(pred, true)


if __name__ == "__main__":
    key = jax.random.PRNGKey(0)
    k1, k2, k3, k4, k5, k6 = jax.random.split(key, 6)

    # 1) Aligned f32 case: batch=16, hidden=128 (lane-aligned).
    B, D = 16, 128
    pred = jax.random.normal(k1, (B, D), dtype=jnp.float32)
    true = jax.random.normal(k2, (B, D), dtype=jnp.float32)
    out = jax.block_until_ready(loss_wrapper_forward(pred, true))
    ref = jnp.mean((pred - true) ** 2)
    assert jnp.allclose(out, ref, rtol=1e-5, atol=1e-6), (out, ref)

    # 2) Ragged batch (exercises the masked tail tile; no divisibility assert).
    Br = 10
    pred_r = jax.random.normal(k3, (Br, D), dtype=jnp.float32)
    true_r = jax.random.normal(k4, (Br, D), dtype=jnp.float32)
    out_r = jax.block_until_ready(loss_wrapper_forward(pred_r, true_r))
    ref_r = jnp.mean((pred_r - true_r) ** 2)
    assert jnp.allclose(out_r, ref_r, rtol=1e-5, atol=1e-6), (out_r, ref_r)

    # 3) bf16 inputs (halved HBM traffic; upcast to f32 inside the kernel).
    pred_h = pred.astype(jnp.bfloat16)
    true_h = true.astype(jnp.bfloat16)
    out_h = jax.block_until_ready(loss_wrapper_forward(pred_h, true_h))
    ref_h = jnp.mean((pred_h.astype(jnp.float32) - true_h.astype(jnp.float32)) ** 2)
    assert jnp.allclose(out_h, ref_h, rtol=1e-5, atol=1e-6), (out_h, ref_h)

    # 4) Medium case exercising multi-tile / multi-chunk / lane-fold / mask paths.
    Bm, Dm = 2112, 384
    pred_m = jax.random.normal(k5, (Bm, Dm), dtype=jnp.float32)
    true_m = jax.random.normal(k6, (Bm, Dm), dtype=jnp.float32)
    out_m = jax.block_until_ready(loss_wrapper_forward(pred_m, true_m))
    ref_m = jnp.mean((pred_m - true_m) ** 2)
    assert jnp.allclose(out_m, ref_m, rtol=1e-4, atol=1e-5), (out_m, ref_m)

    # 5) Zero-length branch of LossWrapper.forward.
    empty = jnp.zeros((0, D), dtype=jnp.float32)
    zero = jax.block_until_ready(loss_wrapper_forward(empty, empty))
    assert float(zero) == 0.0

    print("KERNEL_OK")
</pallas_src>

<mosaic_0001>
module attributes {stable_mosaic.version = 11 : i64} {
  func.func @_mse_partial_kernel(%arg0: i32, %arg1: i32, %arg2: memref<16x128xf32, #tpu.memory_space<vmem>>, %arg3: memref<16x128xf32, #tpu.memory_space<vmem>>, %arg4: memref<1x1x8x128xf32, #tpu.memory_space<vmem>>) attributes {dimension_semantics = [#tpu.dimension_semantics<parallel>, #tpu.dimension_semantics<parallel>], iteration_bounds = array<i64: 1, 1>, scalar_prefetch = 0 : i64, scratch_operands = 0 : i64, tpu.core_type = #tpu.core_type<tc>, window_params = [{transform_indices = @transform_0, window_bounds = array<i64: 16, 128>}, {transform_indices = @transform_1, window_bounds = array<i64: 16, 128>}, {transform_indices = @transform_2, window_bounds = array<i64: 1, 1, 8, 128>}]} {
    %cst = arith.constant 0.000000e+00 : f32
    %0 = vector.broadcast %cst : f32 to vector<8x128xf32>
    %c0 = arith.constant 0 : index
    %c0_0 = arith.constant 0 : index
    %1 = vector.load %arg2[%c0, %c0_0] : memref<16x128xf32, #tpu.memory_space<vmem>>, vector<16x128xf32>
    %c0_1 = arith.constant 0 : index
    %c0_2 = arith.constant 0 : index
    %2 = vector.load %arg3[%c0_1, %c0_2] : memref<16x128xf32, #tpu.memory_space<vmem>>, vector<16x128xf32>
    %3 = arith.subf %1, %2 : vector<16x128xf32>
    %4 = arith.mulf %3, %3 : vector<16x128xf32>
    %5 = vector.shape_cast %4 : vector<16x128xf32> to vector<2x8x128xf32>
    %cst_3 = arith.constant dense<0.000000e+00> : vector<8x128xf32>
    %6 = vector.multi_reduction <add>, %5, %cst_3 [0] : vector<2x8x128xf32> to vector<8x128xf32>
    %7 = arith.addf %0, %6 : vector<8x128xf32>
    %8 = vector.shape_cast %7 : vector<8x128xf32> to vector<1x1x8x128xf32>
    %c0_4 = arith.constant 0 : index
    %c0_5 = arith.constant 0 : index
    %c0_6 = arith.constant 0 : index
    %c0_7 = arith.constant 0 : index
    %9 = vector.load %arg4[%c0_4, %c0_5, %c0_6, %c0_7] : memref<1x1x8x128xf32, #tpu.memory_space<vmem>>, vector<1x1x8x128xf32>
    tpu.vector_store %arg4[%c0_4, %c0_5, %c0_6, %c0_7], %8 {strides = array<i32>} : memref<1x1x8x128xf32, #tpu.memory_space<vmem>>, vector<1x1x8x128xf32>,
    return
  }
  func.func @transform_0(%arg0: i32, %arg1: i32) -> (i32, i32) {
    %c0_i32 = arith.constant 0 : i32
    return %arg0, %arg1 : i32, i32
  }
  func.func @transform_1(%arg0: i32, %arg1: i32) -> (i32, i32) {
    %c0_i32 = arith.constant 0 : i32
    return %arg0, %arg1 : i32, i32
  }
  func.func @transform_2(%arg0: i32, %arg1: i32) -> (i32, i32, i32, i32) {
    %c0_i32 = arith.constant 0 : i32
    %c0_i32_0 = arith.constant 0 : i32
    %c0_i32_1 = arith.constant 0 : i32
    return %arg0, %arg1, %c0_i32, %c0_i32_0 : i32, i32, i32, i32
  }
}

</mosaic_0001>

<bundles_post_ra>
// kernel: tpu_custom_call.1
= control target key start
LH: loop header
LB: loop body
LE: loop exit
PB: predicated region body
PF: predicated region fallthrough
CT: control target
= control target key end

     0   :  { %7 = vsyncpa [#allocation3], 0  ;;  %s200_s0 = inlined_call_operand.hbm [shape: f32[16,128], index: 0, kind: input, shape index: {}]   ;;  %s201_s1 = inlined_call_operand.hbm [shape: f32[16,128], index: 1, kind: input, shape index: {}]   ;;  %s202_s2 = inlined_call_operand.hbm [shape: f32[1,1,8,128], index: 2, kind: output, shape index: {}]  }
   0x1   :  { %8 = vsyncpa [#allocation6], 0 }
   0x2   :  { %9 = vsyncpa [#allocation4], 0  ;;  %s144_s9 = smov [#allocation2]   ;;  %s72_s13 = scalar_lea.hbm %s200_s0, 256 }
   0x3   :  { %s15_s10 = sshll.u32 %s144_s9, 4  ;;  %p73_p0 = scmp.ne.s32.totalorder %s200_s0, %s72_s13  ;;  %s16_s10 = int_to_ptr.vmem [resolvable:$true] %s15_s10 }
   0x4   :  { %p76_p1 = scmp.lt.u32.totalorder %s72_s13, %s200_s0 }
   0x6   :  { %p78_p2 = pnand %p76_p1, %p73_p0 }
   0x8   :  { %81 = shalt.err (!%p78_p2)
}
   0x9   :  { %s82_s18 = scalar_lea.vmem %s16_s10, 256  ;;  %p87_p4 = scmp.lt.s32.totalorder %s16_s10, %s16_s10 }
   0xa   :  { %p83_p3 = scmp.ne.s32.totalorder %s16_s10, %s82_s18  ;;  %p88_p5 = scmp.lt.s32.totalorder %s82_s18, %s82_s18 }
   0xc   :  { %p89_p6 = por %p88_p5, %p87_p4 }
   0xe   :  { %p90_p7 = pnand %p89_p6, %p83_p3 }
  0x10   :  { %93 = shalt.err (!%p90_p7)
}
  0x11   :  { %s145_s19 = smov 128   ;;  %s146_s20 = smov 8  }
  0x12   :  { %21 = dma.hbm_to_vmem [thread:$0]  %s200_s0, 256, %s16_s10, [#allocation3], %s145_s19, %s145_s19, %s146_s20  }
  0x13   :  { %s147_s23 = smov [#allocation5]   ;;  %s94_s27 = scalar_lea.hbm %s201_s1, 256 }
  0x14   :  { %s27_s24 = sshll.u32 %s147_s23, 4  ;;  %p95_p8 = scmp.ne.s32.totalorder %s201_s1, %s94_s27  ;;  %s28_s24 = int_to_ptr.vmem [resolvable:$true] %s27_s24 }
  0x15   :  { %p98_p9 = scmp.lt.u32.totalorder %s94_s27, %s201_s1 }
  0x17   :  { %p100_p10 = pnand %p98_p9, %p95_p8 }
  0x19   :  { %103 = shalt.err (!%p100_p10)
}
  0x1a   :  { %s104_s4 = scalar_lea.vmem %s28_s24, 256  ;;  %p109_p12 = scmp.lt.s32.totalorder %s28_s24, %s28_s24 }
  0x1b   :  { %p105_p11 = scmp.ne.s32.totalorder %s28_s24, %s104_s4  ;;  %p110_p13 = scmp.lt.s32.totalorder %s104_s4, %s104_s4 }
  0x1d   :  { %p111_p0 = por %p110_p13, %p109_p12 }
  0x1f   :  { %p112_p1 = pnand %p111_p0, %p105_p11 }
  0x21   :  { %115 = shalt.err (!%p112_p1)
}
  0x22   :  { %33 = dma.hbm_to_vmem [thread:$0]  %s201_s1, 256, %s28_s24, [#allocation6], %s145_s19, %s145_s19, %s146_s20  }
  0x23   :  { %138 = dma.done.wait [#allocation3], 256  }
  0x24   :  { %139 = vsyncadd [#allocation3], 4294967040 }
  0x25   :  { %140 = dma.done.wait [#allocation6], 256  }
  0x26   :  { %141 = vsyncadd [#allocation6], 4294967040  ;;  %v40_v0 = vld [vmem:[#allocation2] sm:$0xff]  ;;  %v41_v1 = vld [vmem:[#allocation2 + $0x8] sm:$0xff]  ;;  %s148_s6 = smov [#allocation7]  }
  0x27   :  { %v42_v2 = vld [vmem:[#allocation5] sm:$0xff]  ;;  %v43_v3 = vld [vmem:[#allocation5 + $0x8] sm:$0xff]  ;;  %s57_s7 = sshll.u32 %s148_s6, 4  ;;  %s58_s7 = int_to_ptr.vmem [resolvable:$true] %s57_s7 }
  0x28   :  { %v44_v4 = vsub.f32 %v40_v0, %v42_v2  ;;  %v45_v5 = vsub.f32 %v41_v1, %v43_v3  ;;  %s116_s8 = scalar_lea.vmem %s58_s7, 128  ;;  %p121_p3 = scmp.lt.s32.totalorder %s58_s7, %s58_s7 }
  0x29   :  { %p117_p2 = scmp.ne.s32.totalorder %s58_s7, %s116_s8  ;;  %p122_p4 = scmp.lt.s32.totalorder %s116_s8, %s116_s8 }
  0x2a   :  { %v46_v6 = vmul.f32 %v44_v4, %v44_v4  ;;  %v47_v7 = vmul.f32 %v45_v5, %v45_v5 }
  0x2b   :  { %p123_p5 = por %p122_p4, %p121_p3 }
  0x2c   :  { %v48_v8 = vadd.f32 %v47_v7, %v46_v6 }
  0x2d   :  { %p124_p6 = pnand %p123_p5, %p117_p2 }
  0x2e   :  { %50 = vst [vmem:[#allocation7] sm:$0xff] %v48_v8 }
  0x2f   :  { %127 = shalt.err (!%p124_p6)
}
  0x30   :  { %s128_s10 = scalar_lea.hbm %s202_s2, 128 }
  0x31   :  { %p129_p7 = scmp.ne.s32.totalorder %s202_s2, %s128_s10  ;;  %p132_p8 = scmp.lt.u32.totalorder %s128_s10, %s202_s2 }
  0x33   :  { %p134_p9 = pnand %p132_p8, %p129_p7 }
  0x35   :  { %137 = shalt.err (!%p134_p9)
}
  0x36   :  { %60 = dma.vmem_to_hbm [thread:$0]  %s58_s7, 128, %s202_s2, [#allocation4]  }
  0x37   :  { %142 = dma.done.wait [#allocation4], 128  }
  0x38   :  { %143 = vsyncadd [#allocation4], 4294967168 }
  0x39   :  { %64 = vsyncpa [#allocation3], 1 }
  0x3a   :  { %65 = vsyncpa [#allocation6], 1 }
  0x3b   :  { %66 = vsyncpa [#allocation4], 1 }

</bundles_post_ra>
